<compile_context>
chip_gen: v6e
topology: v6e:2x2x1
jax: 0.10.0
libtpu: 0.0.40
codegen_flags: <defaults>
</compile_context>

<pallas_src>
import jax
import jax.numpy as jnp
from jax import lax
from jax.experimental import pallas as pl
from jax.experimental.pallas import tpu as pltpu

T_CONST = 170.0
EPS = 1e-12
_REF_PREC = lax.Precision.HIGHEST      # only used by the pure-JAX reference


# ------------------------------- Pallas kernel -------------------------------

def gmsd_kernel(x_ref, y_ref, out_ref):
    # x_ref, y_ref: (Bn, 3, H, W) f32 VMEM blocks; out_ref: (Bn, 8, 128) f32.
    Bn, _, H, W = x_ref.shape
    R = Bn * H                                   # batch folded onto the row axis

    # Per-image boundary / validity masks as broadcastable vectors (not full matrices).
    gr = lax.broadcasted_iota(jnp.int32, (R, 1), 0)
    ri = gr % H                                  # row index within its own image
    gc = lax.broadcasted_iota(jnp.int32, (1, W), 1)

    def f32mask(cond):
        return jnp.where(cond, 1.0, 0.0).astype(jnp.float32)

    row_has_prev = f32mask(ri >= 2)              # pooled row i-1 exists
    row_has_next = f32mask(ri <= H - 3)          # pooled row i+1 exists
    col_has_prev = f32mask(gc >= 2)              # pooled col j-1 exists
    col_has_next = f32mask(gc <= W - 3)          # pooled col j+1 exists
    row_valid = f32mask(ri % 2 == 0)             # (even, even) == the pooled grid
    col_valid = f32mask(gc % 2 == 0)

    # Shift-by-2 neighbours with zero padding in pooled coordinates.  The same
    # masks also kill any leakage across the images stacked along the row axis.
    def prev2_row(v):
        return pltpu.roll(v, shift=2, axis=0) * row_has_prev

    def next2_row(v):
        return pltpu.roll(v, shift=R - 2, axis=0) * row_has_next

    def prev2_col(v):
        return pltpu.roll(v, shift=2, axis=1) * col_has_prev

    def next2_col(v):
        return pltpu.roll(v, shift=W - 2, axis=1) * col_has_next

    def grad_mag(img4):                          # img4: (Bn, 3, H, W)
        # to_y_channel(img, 255): BT.601 Y channel, range ~[16, 235].
        # TODO(synk): some pyiqa versions subtract 0.5 for out_data_range>=255;
        # omitted here to match the reference formula below.
        yimg = (65.481 * img4[:, 0] + 128.553 * img4[:, 1]
                + 24.966 * img4[:, 2] + 16.0)          # (Bn, H, W)
        yimg = yimg.reshape(R, W)                       # fold batch onto sublanes
        # 2x2 stride-2 avg pool kept "dilated" at full resolution: P[2i, 2j] is
        # the pooled value; odd rows/cols hold junk that is never read at the
        # (even, even) positions the shift-by-2 filters / masked reduction use.
        nr = pltpu.roll(yimg, shift=R - 1, axis=0)      # Y[r+1, c]
        pooled = 0.25 * (yimg + nr
                         + pltpu.roll(yimg, shift=W - 1, axis=1)
                         + pltpu.roll(nr, shift=W - 1, axis=1))
        # 3x3 dx / dy filters (zero padding in pooled coords) as shift-by-2
        # three-tap roll filters on the dilated grid.
        cdx = prev2_col(pooled) - next2_col(pooled)     # horizontal central diff
        cdy = prev2_row(pooled) - next2_row(pooled)     # vertical central diff
        ix = (cdx + prev2_row(cdx) + next2_row(cdx)) * (1.0 / 3.0)
        iy = (cdy + prev2_col(cdy) + next2_col(cdy)) * (1.0 / 3.0)
        return jnp.sqrt(ix * ix + iy * iy + EPS)        # (R, W), valid at (even, even)

    g1 = grad_mag(x_ref[...])
    g2 = grad_mag(y_ref[...])

    # q = (2 g1 g2 + T) / (g1^2 + g2^2 + T) = 1 - d  with
    # d = (g1 - g2)^2 / (g1^2 + g2^2 + T);  std(q) == std(d), and d clusters
    # near 0 so a single-pass (sum, sum-of-squares) variance is safe.
    diff = g1 - g2
    den = g1 * g1 + g2 * g2 + T_CONST
    d = (diff * diff) * pl.reciprocal(den, approx=True)    # EUP reciprocal
    d = d * row_valid * col_valid                          # keep pooled grid points only

    d3 = d.reshape(Bn, H, W)
    s1 = jnp.sum(jnp.sum(d3, axis=2, keepdims=True), axis=1, keepdims=True)  # (Bn,1,1)
    s2 = jnp.sum(jnp.sum(d3 * d3, axis=2, keepdims=True), axis=1, keepdims=True)

    m = float((H // 2) * (W // 2))
    var = (s2 - s1 * s1 * (1.0 / m)) * (1.0 / (m - 1.0))   # torch.std: unbiased (ddof=1)
    score = jnp.sqrt(jnp.maximum(var, 0.0))                # (Bn, 1, 1)
    out_ref[...] = jnp.broadcast_to(score, (Bn, 8, 128))


# ------------------------------ Python wrapper -------------------------------

def gmsd_pallas(x, y):
    """GMSD score per batch element. x, y: (N, 3, H, W) RGB in [0, 1]."""
    assert x.shape == y.shape
    N, C, H, W = x.shape
    assert C == 3 and H % 2 == 0 and W % 2 == 0

    x = x.astype(jnp.float32)
    y = y.astype(jnp.float32)

    per_pair_bytes = 2 * C * H * W * 4        # x + y for one batch element
    vmem_factor = 5                           # dbl-buffered inputs + f32 temporaries

    try:
        vmem_cap = int(pltpu.get_tpu_info().vmem_capacity_bytes)
    except Exception:
        vmem_cap = 64 << 20                   # v7x-sized fallback, valid everywhere
    usable = max(vmem_cap - (8 << 20), 8 << 20)

    # Pack several batch elements per grid step (amortizes ~0.35us/step and lets
    # the kernel vectorize the elementwise work over bn), but keep the grid
    # length >= 2 so the "parallel" axis can shard across v7x's two TensorCores.
    block_n = max(1, min(N, usable // (vmem_factor * per_pair_bytes)))
    if N > 1:
        block_n = min(block_n, -(-N // 2))    # ceil(N/2) -> grid >= 2
    while N % block_n:
        block_n -= 1
    grid = (N // block_n,)

    est = vmem_factor * block_n * per_pair_bytes + (4 << 20)
    vmem_limit = int(min(max(est, 32 << 20), vmem_cap - (2 << 20)))
    # TODO(synk): HD-class images with block_n=1 can still exceed v7x's 64 MiB
    # VMEM; that regime needs a row-strip Y/pool prepass kernel (12x smaller
    # stage-2 traffic) instead of whole-image blocks.
    # TODO(synk): for very narrow images (W << 128) lane utilization could be
    # improved further by folding batch onto the lane axis (wrapper transpose).

    out = pl.pallas_call(
        gmsd_kernel,
        out_shape=jax.ShapeDtypeStruct((N, 8, 128), jnp.float32),
        grid_spec=pltpu.PrefetchScalarGridSpec(
            num_scalar_prefetch=0,
            grid=grid,
            in_specs=[
                pl.BlockSpec((block_n, C, H, W), lambda n: (n, 0, 0, 0)),
                pl.BlockSpec((block_n, C, H, W), lambda n: (n, 0, 0, 0)),
            ],
            out_specs=pl.BlockSpec((block_n, 8, 128), lambda n: (n, 0, 0)),
        ),
        compiler_params=pltpu.CompilerParams(
            dimension_semantics=("parallel",),    # batch elements are independent
            vmem_limit_bytes=vmem_limit,
        ),
    )(x, y)
    return out[:, 0, 0]


# --------------------------- pure-JAX reference ------------------------------

def gmsd_ref(x, y, T=170.0):
    def to_y(img):
        r, g, b = img[:, 0], img[:, 1], img[:, 2]
        return (65.481 * r + 128.553 * g + 24.966 * b + 16.0)[:, None]

    X, Y = to_y(x), to_y(y)
    ave = jnp.ones((1, 1, 2, 2), jnp.float32) / 4.0
    dx = (jnp.array([[1, 0, -1], [1, 0, -1], [1, 0, -1]], jnp.float32) / 3.0)[None, None]
    dy = (jnp.array([[1, 1, 1], [0, 0, 0], [-1, -1, -1]], jnp.float32) / 3.0)[None, None]

    def conv(img, w, s, p):
        return lax.conv_general_dilated(
            img, w, (s, s), [(p, p), (p, p)],
            dimension_numbers=("NCHW", "OIHW", "NCHW"), precision=_REF_PREC)

    Y1, Y2 = conv(X, ave, 2, 0), conv(Y, ave, 2, 0)
    g1 = jnp.sqrt(conv(Y1, dx, 1, 1) ** 2 + conv(Y1, dy, 1, 1) ** 2 + EPS)
    g2 = jnp.sqrt(conv(Y2, dx, 1, 1) ** 2 + conv(Y2, dy, 1, 1) ** 2 + EPS)
    q = (2 * g1 * g2 + T) / (g1 ** 2 + g2 ** 2 + T)
    return jnp.std(q.reshape(q.shape[0], -1), axis=1, ddof=1)


if __name__ == "__main__":
    key = jax.random.PRNGKey(0)
    k1, k2 = jax.random.split(key)
    N, C, H, W = 2, 3, 16, 16
    x = jax.random.uniform(k1, (N, C, H, W), dtype=jnp.float32)
    y = jax.random.uniform(k2, (N, C, H, W), dtype=jnp.float32)

    score = jax.block_until_ready(gmsd_pallas(x, y))
    ref = jax.block_until_ready(gmsd_ref(x, y))

    assert score.shape == (N,), score.shape
    assert jnp.allclose(score, ref, atol=2e-3, rtol=2e-3), (score, ref)
    print("KERNEL_OK")
</pallas_src>

<mosaic_0001>
module attributes {stable_mosaic.version = 11 : i64} {
  func.func @gmsd_kernel(%arg0: i32, %arg1: memref<1x3x16x16xf32, #tpu.memory_space<vmem>>, %arg2: memref<1x3x16x16xf32, #tpu.memory_space<vmem>>, %arg3: memref<1x8x128xf32, #tpu.memory_space<vmem>>) attributes {dimension_semantics = [#tpu.dimension_semantics<parallel>], iteration_bounds = array<i64: 2>, scalar_prefetch = 0 : i64, scratch_operands = 0 : i64, tpu.core_type = #tpu.core_type<tc>, window_params = [{transform_indices = @transform_0, window_bounds = array<i64: 1, 3, 16, 16>}, {transform_indices = @transform_1, window_bounds = array<i64: 1, 3, 16, 16>}, {transform_indices = @transform_2, window_bounds = array<i64: 1, 8, 128>}]} {
    %0 = tpu.iota {dimensions = array<i32: 0>} : vector<16x1xi32>
    %c16_i32 = arith.constant 16 : i32
    %c0_i32 = arith.constant 0 : i32
    %1 = arith.cmpi eq, %c16_i32, %c0_i32 : i32
    %c1_i32 = arith.constant 1 : i32
    %2 = arith.select %1, %c1_i32, %c16_i32 : i32
    %3 = vector.broadcast %2 : i32 to vector<16x1xi32>
    %4 = arith.remsi %0, %3 : vector<16x1xi32>
    %c0_i32_0 = arith.constant 0 : i32
    %5 = vector.broadcast %c0_i32_0 : i32 to vector<16x1xi32>
    %6 = arith.cmpi ne, %4, %5 : vector<16x1xi32>
    %c0_i32_1 = arith.constant 0 : i32
    %7 = vector.broadcast %c0_i32_1 : i32 to vector<16x1xi32>
    %8 = arith.cmpi slt, %4, %7 : vector<16x1xi32>
    %c0_i32_2 = arith.constant 0 : i32
    %9 = arith.cmpi slt, %2, %c0_i32_2 : i32
    %10 = vector.broadcast %9 : i1 to vector<16x1xi1>
    %11 = vector.broadcast %10 : vector<16x1xi1> to vector<16x1xi1>
    %12 = arith.xori %8, %11 : vector<16x1xi1>
    %13 = arith.andi %12, %6 : vector<16x1xi1>
    %14 = vector.broadcast %2 : i32 to vector<16x1xi32>
    %15 = arith.addi %4, %14 : vector<16x1xi32>
    %16 = arith.select %13, %15, %4 : vector<16x1xi1>, vector<16x1xi32>
    %17 = tpu.iota {dimensions = array<i32: 1>} : vector<1x16xi32>
    %c2_i32 = arith.constant 2 : i32
    %18 = vector.broadcast %c2_i32 : i32 to vector<16x1xi32>
    %19 = arith.cmpi sge, %16, %18 : vector<16x1xi32>
    %cst = arith.constant 1.000000e+00 : f32
    %cst_3 = arith.constant 0.000000e+00 : f32
    %20 = vector.broadcast %cst : f32 to vector<16x1xf32>
    %21 = vector.broadcast %cst_3 : f32 to vector<16x1xf32>
    %22 = arith.select %19, %20, %21 : vector<16x1xi1>, vector<16x1xf32>
    %c13_i32 = arith.constant 13 : i32
    %23 = vector.broadcast %c13_i32 : i32 to vector<16x1xi32>
    %24 = arith.cmpi sle, %16, %23 : vector<16x1xi32>
    %cst_4 = arith.constant 1.000000e+00 : f32
    %cst_5 = arith.constant 0.000000e+00 : f32
    %25 = vector.broadcast %cst_4 : f32 to vector<16x1xf32>
    %26 = vector.broadcast %cst_5 : f32 to vector<16x1xf32>
    %27 = arith.select %24, %25, %26 : vector<16x1xi1>, vector<16x1xf32>
    %c2_i32_6 = arith.constant 2 : i32
    %28 = vector.broadcast %c2_i32_6 : i32 to vector<1x16xi32>
    %29 = arith.cmpi sge, %17, %28 : vector<1x16xi32>
    %cst_7 = arith.constant 1.000000e+00 : f32
    %cst_8 = arith.constant 0.000000e+00 : f32
    %30 = vector.broadcast %cst_7 : f32 to vector<1x16xf32>
    %31 = vector.broadcast %cst_8 : f32 to vector<1x16xf32>
    %32 = arith.select %29, %30, %31 : vector<1x16xi1>, vector<1x16xf32>
    %c13_i32_9 = arith.constant 13 : i32
    %33 = vector.broadcast %c13_i32_9 : i32 to vector<1x16xi32>
    %34 = arith.cmpi sle, %17, %33 : vector<1x16xi32>
    %cst_10 = arith.constant 1.000000e+00 : f32
    %cst_11 = arith.constant 0.000000e+00 : f32
    %35 = vector.broadcast %cst_10 : f32 to vector<1x16xf32>
    %36 = vector.broadcast %cst_11 : f32 to vector<1x16xf32>
    %37 = arith.select %34, %35, %36 : vector<1x16xi1>, vector<1x16xf32>
    %c2_i32_12 = arith.constant 2 : i32
    %c0_i32_13 = arith.constant 0 : i32
    %38 = arith.cmpi eq, %c2_i32_12, %c0_i32_13 : i32
    %c1_i32_14 = arith.constant 1 : i32
    %39 = arith.select %38, %c1_i32_14, %c2_i32_12 : i32
    %40 = vector.broadcast %39 : i32 to vector<16x1xi32>
    %41 = arith.remsi %16, %40 : vector<16x1xi32>
    %c0_i32_15 = arith.constant 0 : i32
    %42 = vector.broadcast %c0_i32_15 : i32 to vector<16x1xi32>
    %43 = arith.cmpi ne, %41, %42 : vector<16x1xi32>
    %c0_i32_16 = arith.constant 0 : i32
    %44 = vector.broadcast %c0_i32_16 : i32 to vector<16x1xi32>
    %45 = arith.cmpi slt, %41, %44 : vector<16x1xi32>
    %c0_i32_17 = arith.constant 0 : i32
    %46 = arith.cmpi slt, %39, %c0_i32_17 : i32
    %47 = vector.broadcast %46 : i1 to vector<16x1xi1>
    %48 = vector.broadcast %47 : vector<16x1xi1> to vector<16x1xi1>
    %49 = arith.xori %45, %48 : vector<16x1xi1>
    %50 = arith.andi %49, %43 : vector<16x1xi1>
    %51 = vector.broadcast %39 : i32 to vector<16x1xi32>
    %52 = arith.addi %41, %51 : vector<16x1xi32>
    %53 = arith.select %50, %52, %41 : vector<16x1xi1>, vector<16x1xi32>
    %c0_i32_18 = arith.constant 0 : i32
    %54 = vector.broadcast %c0_i32_18 : i32 to vector<16x1xi32>
    %55 = arith.cmpi eq, %53, %54 : vector<16x1xi32>
    %cst_19 = arith.constant 1.000000e+00 : f32
    %cst_20 = arith.constant 0.000000e+00 : f32
    %56 = vector.broadcast %cst_19 : f32 to vector<16x1xf32>
    %57 = vector.broadcast %cst_20 : f32 to vector<16x1xf32>
    %58 = arith.select %55, %56, %57 : vector<16x1xi1>, vector<16x1xf32>
    %c2_i32_21 = arith.constant 2 : i32
    %c0_i32_22 = arith.constant 0 : i32
    %59 = arith.cmpi eq, %c2_i32_21, %c0_i32_22 : i32
    %c1_i32_23 = arith.constant 1 : i32
    %60 = arith.select %59, %c1_i32_23, %c2_i32_21 : i32
    %61 = vector.broadcast %60 : i32 to vector<1x16xi32>
    %62 = arith.remsi %17, %61 : vector<1x16xi32>
    %c0_i32_24 = arith.constant 0 : i32
    %63 = vector.broadcast %c0_i32_24 : i32 to vector<1x16xi32>
    %64 = arith.cmpi ne, %62, %63 : vector<1x16xi32>
    %c0_i32_25 = arith.constant 0 : i32
    %65 = vector.broadcast %c0_i32_25 : i32 to vector<1x16xi32>
    %66 = arith.cmpi slt, %62, %65 : vector<1x16xi32>
    %c0_i32_26 = arith.constant 0 : i32
    %67 = arith.cmpi slt, %60, %c0_i32_26 : i32
    %68 = vector.broadcast %67 : i1 to vector<1x16xi1>
    %69 = vector.broadcast %68 : vector<1x16xi1> to vector<1x16xi1>
    %70 = arith.xori %66, %69 : vector<1x16xi1>
    %71 = arith.andi %70, %64 : vector<1x16xi1>
    %72 = vector.broadcast %60 : i32 to vector<1x16xi32>
    %73 = arith.addi %62, %72 : vector<1x16xi32>
    %74 = arith.select %71, %73, %62 : vector<1x16xi1>, vector<1x16xi32>
    %c0_i32_27 = arith.constant 0 : i32
    %75 = vector.broadcast %c0_i32_27 : i32 to vector<1x16xi32>
    %76 = arith.cmpi eq, %74, %75 : vector<1x16xi32>
    %cst_28 = arith.constant 1.000000e+00 : f32
    %cst_29 = arith.constant 0.000000e+00 : f32
    %77 = vector.broadcast %cst_28 : f32 to vector<1x16xf32>
    %78 = vector.broadcast %cst_29 : f32 to vector<1x16xf32>
    %79 = arith.select %76, %77, %78 : vector<1x16xi1>, vector<1x16xf32>
    %c0 = arith.constant 0 : index
    %c0_30 = arith.constant 0 : index
    %c0_31 = arith.constant 0 : index
    %c0_32 = arith.constant 0 : index
    %80 = vector.load %arg1[%c0, %c0_30, %c0_31, %c0_32] : memref<1x3x16x16xf32, #tpu.memory_space<vmem>>, vector<1x3x16x16xf32>
    %81 = vector.extract_strided_slice %80 {offsets = [0, 0, 0, 0], sizes = [1, 1, 16, 16], strides = [1, 1, 1, 1]} : vector<1x3x16x16xf32> to vector<1x1x16x16xf32>
    %82 = vector.shape_cast %81 : vector<1x1x16x16xf32> to vector<1x16x16xf32>
    %cst_33 = arith.constant 6.548100e+01 : f32
    %83 = vector.broadcast %cst_33 : f32 to vector<1x16x16xf32>
    %84 = arith.mulf %83, %82 : vector<1x16x16xf32>
    %85 = vector.extract_strided_slice %80 {offsets = [0, 1, 0, 0], sizes = [1, 1, 16, 16], strides = [1, 1, 1, 1]} : vector<1x3x16x16xf32> to vector<1x1x16x16xf32>
    %86 = vector.shape_cast %85 : vector<1x1x16x16xf32> to vector<1x16x16xf32>
    %cst_34 = arith.constant 1.285530e+02 : f32
    %87 = vector.broadcast %cst_34 : f32 to vector<1x16x16xf32>
    %88 = arith.mulf %87, %86 : vector<1x16x16xf32>
    %89 = arith.addf %84, %88 : vector<1x16x16xf32>
    %90 = vector.extract_strided_slice %80 {offsets = [0, 2, 0, 0], sizes = [1, 1, 16, 16], strides = [1, 1, 1, 1]} : vector<1x3x16x16xf32> to vector<1x1x16x16xf32>
    %91 = vector.shape_cast %90 : vector<1x1x16x16xf32> to vector<1x16x16xf32>
    %cst_35 = arith.constant 2.496600e+01 : f32
    %92 = vector.broadcast %cst_35 : f32 to vector<1x16x16xf32>
    %93 = arith.mulf %92, %91 : vector<1x16x16xf32>
    %94 = arith.addf %89, %93 : vector<1x16x16xf32>
    %cst_36 = arith.constant 1.600000e+01 : f32
    %95 = vector.broadcast %cst_36 : f32 to vector<1x16x16xf32>
    %96 = arith.addf %94, %95 : vector<1x16x16xf32>
    %97 = vector.shape_cast %96 : vector<1x16x16xf32> to vector<16x16xf32>
    %c15_i32 = arith.constant 15 : i32
    %98 = tpu.dynamic_rotate %97 by %c15_i32 dim 0 : vector<16x16xf32>, i32 -> vector<16x16xf32>
    %99 = arith.addf %97, %98 : vector<16x16xf32>
    %c15_i32_37 = arith.constant 15 : i32
    %100 = tpu.dynamic_rotate %97 by %c15_i32_37 dim 1 : vector<16x16xf32>, i32 -> vector<16x16xf32>
    %101 = arith.addf %99, %100 : vector<16x16xf32>
    %c15_i32_38 = arith.constant 15 : i32
    %102 = tpu.dynamic_rotate %98 by %c15_i32_38 dim 1 : vector<16x16xf32>, i32 -> vector<16x16xf32>
    %103 = arith.addf %101, %102 : vector<16x16xf32>
    %cst_39 = arith.constant 2.500000e-01 : f32
    %104 = vector.broadcast %cst_39 : f32 to vector<16x16xf32>
    %105 = arith.mulf %104, %103 : vector<16x16xf32>
    %c2_i32_40 = arith.constant 2 : i32
    %106 = tpu.dynamic_rotate %105 by %c2_i32_40 dim 1 : vector<16x16xf32>, i32 -> vector<16x16xf32>
    %107 = vector.broadcast %32 : vector<1x16xf32> to vector<16x16xf32>
    %108 = arith.mulf %106, %107 : vector<16x16xf32>
    %c14_i32 = arith.constant 14 : i32
    %109 = tpu.dynamic_rotate %105 by %c14_i32 dim 1 : vector<16x16xf32>, i32 -> vector<16x16xf32>
    %110 = vector.broadcast %37 : vector<1x16xf32> to vector<16x16xf32>
    %111 = arith.mulf %109, %110 : vector<16x16xf32>
    %112 = arith.subf %108, %111 : vector<16x16xf32>
    %c2_i32_41 = arith.constant 2 : i32
    %113 = tpu.dynamic_rotate %105 by %c2_i32_41 dim 0 : vector<16x16xf32>, i32 -> vector<16x16xf32>
    %114 = vector.broadcast %22 : vector<16x1xf32> to vector<16x16xf32>
    %115 = arith.mulf %113, %114 : vector<16x16xf32>
    %c14_i32_42 = arith.constant 14 : i32
    %116 = tpu.dynamic_rotate %105 by %c14_i32_42 dim 0 : vector<16x16xf32>, i32 -> vector<16x16xf32>
    %117 = vector.broadcast %27 : vector<16x1xf32> to vector<16x16xf32>
    %118 = arith.mulf %116, %117 : vector<16x16xf32>
    %119 = arith.subf %115, %118 : vector<16x16xf32>
    %c2_i32_43 = arith.constant 2 : i32
    %120 = tpu.dynamic_rotate %112 by %c2_i32_43 dim 0 : vector<16x16xf32>, i32 -> vector<16x16xf32>
    %121 = vector.broadcast %22 : vector<16x1xf32> to vector<16x16xf32>
    %122 = arith.mulf %120, %121 : vector<16x16xf32>
    %123 = arith.addf %112, %122 : vector<16x16xf32>
    %c14_i32_44 = arith.constant 14 : i32
    %124 = tpu.dynamic_rotate %112 by %c14_i32_44 dim 0 : vector<16x16xf32>, i32 -> vector<16x16xf32>
    %125 = vector.broadcast %27 : vector<16x1xf32> to vector<16x16xf32>
    %126 = arith.mulf %124, %125 : vector<16x16xf32>
    %127 = arith.addf %123, %126 : vector<16x16xf32>
    %cst_45 = arith.constant 0.333333343 : f32
    %128 = vector.broadcast %cst_45 : f32 to vector<16x16xf32>
    %129 = arith.mulf %127, %128 : vector<16x16xf32>
    %c2_i32_46 = arith.constant 2 : i32
    %130 = tpu.dynamic_rotate %119 by %c2_i32_46 dim 1 : vector<16x16xf32>, i32 -> vector<16x16xf32>
    %131 = vector.broadcast %32 : vector<1x16xf32> to vector<16x16xf32>
    %132 = arith.mulf %130, %131 : vector<16x16xf32>
    %133 = arith.addf %119, %132 : vector<16x16xf32>
    %c14_i32_47 = arith.constant 14 : i32
    %134 = tpu.dynamic_rotate %119 by %c14_i32_47 dim 1 : vector<16x16xf32>, i32 -> vector<16x16xf32>
    %135 = vector.broadcast %37 : vector<1x16xf32> to vector<16x16xf32>
    %136 = arith.mulf %134, %135 : vector<16x16xf32>
    %137 = arith.addf %133, %136 : vector<16x16xf32>
    %cst_48 = arith.constant 0.333333343 : f32
    %138 = vector.broadcast %cst_48 : f32 to vector<16x16xf32>
    %139 = arith.mulf %137, %138 : vector<16x16xf32>
    %140 = arith.mulf %129, %129 : vector<16x16xf32>
    %141 = arith.mulf %139, %139 : vector<16x16xf32>
    %142 = arith.addf %140, %141 : vector<16x16xf32>
    %cst_49 = arith.constant 9.99999996E-13 : f32
    %143 = vector.broadcast %cst_49 : f32 to vector<16x16xf32>
    %144 = arith.addf %142, %143 : vector<16x16xf32>
    %145 = math.sqrt %144 : vector<16x16xf32>
    %c0_50 = arith.constant 0 : index
    %c0_51 = arith.constant 0 : index
    %c0_52 = arith.constant 0 : index
    %c0_53 = arith.constant 0 : index
    %146 = vector.load %arg2[%c0_50, %c0_51, %c0_52, %c0_53] : memref<1x3x16x16xf32, #tpu.memory_space<vmem>>, vector<1x3x16x16xf32>
    %147 = vector.extract_strided_slice %146 {offsets = [0, 0, 0, 0], sizes = [1, 1, 16, 16], strides = [1, 1, 1, 1]} : vector<1x3x16x16xf32> to vector<1x1x16x16xf32>
    %148 = vector.shape_cast %147 : vector<1x1x16x16xf32> to vector<1x16x16xf32>
    %cst_54 = arith.constant 6.548100e+01 : f32
    %149 = vector.broadcast %cst_54 : f32 to vector<1x16x16xf32>
    %150 = arith.mulf %149, %148 : vector<1x16x16xf32>
    %151 = vector.extract_strided_slice %146 {offsets = [0, 1, 0, 0], sizes = [1, 1, 16, 16], strides = [1, 1, 1, 1]} : vector<1x3x16x16xf32> to vector<1x1x16x16xf32>
    %152 = vector.shape_cast %151 : vector<1x1x16x16xf32> to vector<1x16x16xf32>
    %cst_55 = arith.constant 1.285530e+02 : f32
    %153 = vector.broadcast %cst_55 : f32 to vector<1x16x16xf32>
    %154 = arith.mulf %153, %152 : vector<1x16x16xf32>
    %155 = arith.addf %150, %154 : vector<1x16x16xf32>
    %156 = vector.extract_strided_slice %146 {offsets = [0, 2, 0, 0], sizes = [1, 1, 16, 16], strides = [1, 1, 1, 1]} : vector<1x3x16x16xf32> to vector<1x1x16x16xf32>
    %157 = vector.shape_cast %156 : vector<1x1x16x16xf32> to vector<1x16x16xf32>
    %cst_56 = arith.constant 2.496600e+01 : f32
    %158 = vector.broadcast %cst_56 : f32 to vector<1x16x16xf32>
    %159 = arith.mulf %158, %157 : vector<1x16x16xf32>
    %160 = arith.addf %155, %159 : vector<1x16x16xf32>
    %cst_57 = arith.constant 1.600000e+01 : f32
    %161 = vector.broadcast %cst_57 : f32 to vector<1x16x16xf32>
    %162 = arith.addf %160, %161 : vector<1x16x16xf32>
    %163 = vector.shape_cast %162 : vector<1x16x16xf32> to vector<16x16xf32>
    %c15_i32_58 = arith.constant 15 : i32
    %164 = tpu.dynamic_rotate %163 by %c15_i32_58 dim 0 : vector<16x16xf32>, i32 -> vector<16x16xf32>
    %165 = arith.addf %163, %164 : vector<16x16xf32>
    %c15_i32_59 = arith.constant 15 : i32
    %166 = tpu.dynamic_rotate %163 by %c15_i32_59 dim 1 : vector<16x16xf32>, i32 -> vector<16x16xf32>
    %167 = arith.addf %165, %166 : vector<16x16xf32>
    %c15_i32_60 = arith.constant 15 : i32
    %168 = tpu.dynamic_rotate %164 by %c15_i32_60 dim 1 : vector<16x16xf32>, i32 -> vector<16x16xf32>
    %169 = arith.addf %167, %168 : vector<16x16xf32>
    %cst_61 = arith.constant 2.500000e-01 : f32
    %170 = vector.broadcast %cst_61 : f32 to vector<16x16xf32>
    %171 = arith.mulf %170, %169 : vector<16x16xf32>
    %c2_i32_62 = arith.constant 2 : i32
    %172 = tpu.dynamic_rotate %171 by %c2_i32_62 dim 1 : vector<16x16xf32>, i32 -> vector<16x16xf32>
    %173 = vector.broadcast %32 : vector<1x16xf32> to vector<16x16xf32>
    %174 = arith.mulf %172, %173 : vector<16x16xf32>
    %c14_i32_63 = arith.constant 14 : i32
    %175 = tpu.dynamic_rotate %171 by %c14_i32_63 dim 1 : vector<16x16xf32>, i32 -> vector<16x16xf32>
    %176 = vector.broadcast %37 : vector<1x16xf32> to vector<16x16xf32>
    %177 = arith.mulf %175, %176 : vector<16x16xf32>
    %178 = arith.subf %174, %177 : vector<16x16xf32>
    %c2_i32_64 = arith.constant 2 : i32
    %179 = tpu.dynamic_rotate %171 by %c2_i32_64 dim 0 : vector<16x16xf32>, i32 -> vector<16x16xf32>
    %180 = vector.broadcast %22 : vector<16x1xf32> to vector<16x16xf32>
    %181 = arith.mulf %179, %180 : vector<16x16xf32>
    %c14_i32_65 = arith.constant 14 : i32
    %182 = tpu.dynamic_rotate %171 by %c14_i32_65 dim 0 : vector<16x16xf32>, i32 -> vector<16x16xf32>
    %183 = vector.broadcast %27 : vector<16x1xf32> to vector<16x16xf32>
    %184 = arith.mulf %182, %183 : vector<16x16xf32>
    %185 = arith.subf %181, %184 : vector<16x16xf32>
    %c2_i32_66 = arith.constant 2 : i32
    %186 = tpu.dynamic_rotate %178 by %c2_i32_66 dim 0 : vector<16x16xf32>, i32 -> vector<16x16xf32>
    %187 = vector.broadcast %22 : vector<16x1xf32> to vector<16x16xf32>
    %188 = arith.mulf %186, %187 : vector<16x16xf32>
    %189 = arith.addf %178, %188 : vector<16x16xf32>
    %c14_i32_67 = arith.constant 14 : i32
    %190 = tpu.dynamic_rotate %178 by %c14_i32_67 dim 0 : vector<16x16xf32>, i32 -> vector<16x16xf32>
    %191 = vector.broadcast %27 : vector<16x1xf32> to vector<16x16xf32>
    %192 = arith.mulf %190, %191 : vector<16x16xf32>
    %193 = arith.addf %189, %192 : vector<16x16xf32>
    %cst_68 = arith.constant 0.333333343 : f32
    %194 = vector.broadcast %cst_68 : f32 to vector<16x16xf32>
    %195 = arith.mulf %193, %194 : vector<16x16xf32>
    %c2_i32_69 = arith.constant 2 : i32
    %196 = tpu.dynamic_rotate %185 by %c2_i32_69 dim 1 : vector<16x16xf32>, i32 -> vector<16x16xf32>
    %197 = vector.broadcast %32 : vector<1x16xf32> to vector<16x16xf32>
    %198 = arith.mulf %196, %197 : vector<16x16xf32>
    %199 = arith.addf %185, %198 : vector<16x16xf32>
    %c14_i32_70 = arith.constant 14 : i32
    %200 = tpu.dynamic_rotate %185 by %c14_i32_70 dim 1 : vector<16x16xf32>, i32 -> vector<16x16xf32>
    %201 = vector.broadcast %37 : vector<1x16xf32> to vector<16x16xf32>
    %202 = arith.mulf %200, %201 : vector<16x16xf32>
    %203 = arith.addf %199, %202 : vector<16x16xf32>
    %cst_71 = arith.constant 0.333333343 : f32
    %204 = vector.broadcast %cst_71 : f32 to vector<16x16xf32>
    %205 = arith.mulf %203, %204 : vector<16x16xf32>
    %206 = arith.mulf %195, %195 : vector<16x16xf32>
    %207 = arith.mulf %205, %205 : vector<16x16xf32>
    %208 = arith.addf %206, %207 : vector<16x16xf32>
    %cst_72 = arith.constant 9.99999996E-13 : f32
    %209 = vector.broadcast %cst_72 : f32 to vector<16x16xf32>
    %210 = arith.addf %208, %209 : vector<16x16xf32>
    %211 = math.sqrt %210 : vector<16x16xf32>
    %212 = arith.subf %145, %211 : vector<16x16xf32>
    %213 = arith.mulf %145, %145 : vector<16x16xf32>
    %214 = arith.mulf %211, %211 : vector<16x16xf32>
    %215 = arith.addf %213, %214 : vector<16x16xf32>
    %cst_73 = arith.constant 1.700000e+02 : f32
    %216 = vector.broadcast %cst_73 : f32 to vector<16x16xf32>
    %217 = arith.addf %215, %216 : vector<16x16xf32>
    %218 = arith.mulf %212, %212 : vector<16x16xf32>
    %219 = tpu.reciprocal %217 {approx = true} : vector<16x16xf32> -> vector<16x16xf32>
    %220 = arith.mulf %218, %219 : vector<16x16xf32>
    %221 = vector.broadcast %58 : vector<16x1xf32> to vector<16x16xf32>
    %222 = arith.mulf %220, %221 : vector<16x16xf32>
    %223 = vector.broadcast %79 : vector<1x16xf32> to vector<16x16xf32>
    %224 = arith.mulf %222, %223 : vector<16x16xf32>
    %225 = vector.shape_cast %224 : vector<16x16xf32> to vector<1x16x16xf32>
    %cst_74 = arith.constant dense<0.000000e+00> : vector<1x16xf32>
    %226 = vector.multi_reduction <add>, %225, %cst_74 [2] : vector<1x16x16xf32> to vector<1x16xf32>
    %227 = vector.shape_cast %226 : vector<1x16xf32> to vector<1x16x1xf32>
    %cst_75 = arith.constant dense<0.000000e+00> : vector<1x1xf32>
    %228 = vector.multi_reduction <add>, %227, %cst_75 [1] : vector<1x16x1xf32> to vector<1x1xf32>
    %229 = vector.shape_cast %228 : vector<1x1xf32> to vector<1x1x1xf32>
    %230 = arith.mulf %225, %225 : vector<1x16x16xf32>
    %cst_76 = arith.constant dense<0.000000e+00> : vector<1x16xf32>
    %231 = vector.multi_reduction <add>, %230, %cst_76 [2] : vector<1x16x16xf32> to vector<1x16xf32>
    %232 = vector.shape_cast %231 : vector<1x16xf32> to vector<1x16x1xf32>
    %cst_77 = arith.constant dense<0.000000e+00> : vector<1x1xf32>
    %233 = vector.multi_reduction <add>, %232, %cst_77 [1] : vector<1x16x1xf32> to vector<1x1xf32>
    %234 = vector.shape_cast %233 : vector<1x1xf32> to vector<1x1x1xf32>
    %235 = arith.mulf %229, %229 : vector<1x1x1xf32>
    %cst_78 = arith.constant 1.562500e-02 : f32
    %236 = vector.broadcast %cst_78 : f32 to vector<1x1x1xf32>
    %237 = arith.mulf %235, %236 : vector<1x1x1xf32>
    %238 = arith.subf %234, %237 : vector<1x1x1xf32>
    %cst_79 = arith.constant 0.0158730168 : f32
    %239 = vector.broadcast %cst_79 : f32 to vector<1x1x1xf32>
    %240 = arith.mulf %238, %239 : vector<1x1x1xf32>
    %cst_80 = arith.constant 0.000000e+00 : f32
    %241 = vector.broadcast %cst_80 : f32 to vector<1x1x1xf32>
    %242 = arith.maximumf %240, %241 : vector<1x1x1xf32>
    %243 = math.sqrt %242 : vector<1x1x1xf32>
    %244 = vector.shape_cast %243 : vector<1x1x1xf32> to vector<1x1x1xf32>
    %245 = vector.broadcast %244 : vector<1x1x1xf32> to vector<1x8x128xf32>
    %c0_81 = arith.constant 0 : index
    %c0_82 = arith.constant 0 : index
    %c0_83 = arith.constant 0 : index
    %246 = vector.load %arg3[%c0_81, %c0_82, %c0_83] : memref<1x8x128xf32, #tpu.memory_space<vmem>>, vector<1x8x128xf32>
    tpu.vector_store %arg3[%c0_81, %c0_82, %c0_83], %245 {strides = array<i32>} : memref<1x8x128xf32, #tpu.memory_space<vmem>>, vector<1x8x128xf32>,
    return
  }
  func.func @transform_0(%arg0: i32) -> (i32, i32, i32, i32) {
    %c0_i32 = arith.constant 0 : i32
    %c0_i32_0 = arith.constant 0 : i32
    %c0_i32_1 = arith.constant 0 : i32
    %c0_i32_2 = arith.constant 0 : i32
    return %arg0, %c0_i32, %c0_i32_0, %c0_i32_1 : i32, i32, i32, i32
  }
  func.func @transform_1(%arg0: i32) -> (i32, i32, i32, i32) {
    %c0_i32 = arith.constant 0 : i32
    %c0_i32_0 = arith.constant 0 : i32
    %c0_i32_1 = arith.constant 0 : i32
    %c0_i32_2 = arith.constant 0 : i32
    return %arg0, %c0_i32, %c0_i32_0, %c0_i32_1 : i32, i32, i32, i32
  }
  func.func @transform_2(%arg0: i32) -> (i32, i32, i32) {
    %c0_i32 = arith.constant 0 : i32
    %c0_i32_0 = arith.constant 0 : i32
    %c0_i32_1 = arith.constant 0 : i32
    return %arg0, %c0_i32, %c0_i32_0 : i32, i32, i32
  }
}

</mosaic_0001>

<bundles_post_ra>
// kernel: tpu_custom_call.1
= control target key start
LH: loop header
LB: loop body
LE: loop exit
PB: predicated region body
PF: predicated region fallthrough
CT: control target
= control target key end

     0   :  { %7 = vsyncpa [#allocation3], 0  ;;  %s1654_s0 = inlined_call_operand.hbm [shape: f32[2,3,16,16], index: 0, kind: input, shape index: {}]   ;;  %s1655_s1 = inlined_call_operand.hbm [shape: f32[2,3,16,16], index: 1, kind: input, shape index: {}]   ;;  %s1656_s2 = inlined_call_operand.hbm [shape: f32[2,8,128], index: 2, kind: output, shape index: {}]  }
   0x1   :  { %9 = vsyncpa [#allocation3 + $0x1], 0 }
   0x2   :  { %10 = vsyncpa [#allocation6], 0 }
   0x3   :  { %12 = vsyncpa [#allocation6 + $0x1], 0 }
   0x4   :  { %13 = vsyncpa [#allocation4], 0 }
   0x5   :  { %15 = vsyncpa [#allocation4 + $0x1], 0  ;;  %s1171_s9 = smov 0   ;;  %s1173_s10 = smov 0  }
   0x6   :  { %s1175_s11 = smov 0   ;;  %s1177_s12 = smov 0  }
   0x7 LB: > { %s1192_s13 = sadd.s32 4294967295, %s1141_s12   ;;  %s926_s14 = sadd.s32 4294967294, %s1141_s12   ;;  %s1141_s12 = sphi %s1177_s12, %s1671_s12   ;;  %s1137_s11 = sphi %s1175_s11, %s1670_s11   ;;  %s1133_s10 = sphi %s1173_s10, %s1669_s10   ;;  %s1129_s9 = sphi %s1171_s9, %s1668_s9  }
   0x8   : > { %s1196_s15 = sadd.s32 1, %s1141_s12   ;;  %s28_s16 = sadd.s32 1, %s1137_s11 }
   0x9   : > { %s25_s17 = ssub.s32 %s1141_s12, %s1196_s15  ;;  %p35_p0 = scmp.ne.s32.totalorder %s1137_s11, %s1133_s10 }
   0xa   : > { %p26_p1 = scmp.eq.s32.totalorder %s25_s17, 0  ;;  %p36_p2 = scmp.eq.s32.totalorder %s1141_s12, 0 }
   0xb   : > { %p41_p3 = scmp.ne.s32.totalorder %s1133_s10, %s1129_s9  ;;  %p42_p4 = scmp.eq.s32.totalorder %s1192_s13, 0 }
   0xc   : > { %s1208_s18 = scalar_select %p26_p1, %s1137_s11, %s28_s16  }
   0xd   : > { %p37_p5 = por %p36_p2, %p35_p0  ;;  %p1210_p6 = por %p42_p4, %p41_p3 }
   0xe   : > { %p91_p7 = scmp.eq.s32.totalorder %s1192_s13, 1  ;;  %p97_p8 = scmp.eq.s32.totalorder %s926_s14, 1 }
   0xf   : > { %s1659_s19 = scalar_select %p1210_p6, 1, 0 }
  0x10   : > { %p959_p10 = scmp.lt.s32.totalorder %s1141_s12, 2  ;;  %p1217_p11 = por %p91_p7, %p35_p0 }
  0x11   : > { %p1221_p12 = por %p97_p8, %p41_p3  ;;  %s1226_s22 = sand.u32 1, %s1137_s11  }
  0x12   : > { %s1660_s20 = scalar_select %p1217_p11, 1, 0 }
  0x13   : > { %s1661_s21 = scalar_select %p1221_p12, 1, 0 }
  0x14   : > { %s938_s23 = smul.u32 768, %s1141_s12  ;;  %p1237_p13 = pnand %p959_p10, %p37_p5 }
  0x15   : > { %s937_s24 = smul.u32 48, %s1226_s22  ;;  %s118_s3 = scalar_lea.sflag [#allocation3], %s1226_s22 }
  0x16   : > { %s1235_s27 = scalar_lea.hbm %s1654_s0, %s938_s23  ;;  %p1019_p1 = pneg %p1237_p13 }
  0x17   : > { %s121_s29 = scalar_lea.vmem [#allocation2], %s937_s24  ;;  %s1017_s4 = scalar_lea.hbm %s1235_s27, 768 }
  0x18   : > { %s128_s30 = sshll.u32 %s121_s29, 4  ;;  %p1018_p0 = scmp.ne.s32.totalorder %s1235_s27, %s1017_s4  ;;  %s1243_s30 = int_to_ptr.vmem [resolvable:$true] %s128_s30 }
  0x19   : > { %s1022_s7 = scalar_lea.hbm %s1654_s0, 1536  ;;  %p1023_p4 = scmp.lt.s32.totalorder %s1235_s27, %s1654_s0 }
  0x1a   : > { %p1020_p2 = pnand %p1019_p1, %p1018_p0  ;;  %p1024_p5 = scmp.lt.s32.totalorder %s1022_s7, %s1017_s4 }
  0x1c   : > { %p1021_p3 = pneg %p1020_p2  ;;  %p1025_p7 = por %p1024_p5, %p1023_p4 }
  0x1e   : > { %p1026_p8 = pnand %p1025_p7, %p1021_p3 }
  0x20   : > { %1029 = shalt.err (!%p1026_p8)
}
  0x21   : > { %s1030_s16 = scalar_lea.vmem %s1243_s30, 768  ;;  %s1143_s17 = smov [#allocation2]  }
  0x22   : > { %p1031_p10 = scmp.ne.s32.totalorder %s1243_s30, %s1030_s16  ;;  %s1035_s25 = sshll.u32 %s1143_s17, 4  ;;  %s1036_s25 = int_to_ptr.vmem [resolvable:$false] %s1035_s25 }
  0x23   : > { %s1037_s26 = scalar_lea.vmem %s1036_s25, 1536  ;;  %p1038_p9 = scmp.lt.s32.totalorder %s1243_s30, %s1036_s25 }
  0x24   : > { %p1033_p0 = pnand %p1031_p10, %p1019_p1  ;;  %p1039_p12 = scmp.lt.s32.totalorder %s1037_s26, %s1030_s16 }
  0x26   : > { %p1034_p2 = pneg %p1033_p0  ;;  %p1040_p11 = por %p1039_p12, %p1038_p9 }
  0x28   : > { %p1041_p4 = pnand %p1040_p11, %p1034_p2 }
  0x2a   : > { %1044 = shalt.err (!%p1041_p4)
}
  0x2b   : > { %s1144_s29 = smov 128   ;;  %s1145_s4 = smov 8  }
  0x2c   : > { %951 = dma.hbm_to_vmem [thread:$0]  (!%p1237_p13), %s1235_s27, 768, %s1243_s30, %s118_s3, %s1144_s29, %s1144_s29, %s1145_s4  }
  0x2d   : > { %p931_p9 = scmp.ge.s32.totalorder %s1141_s12, 1  ;;  %p157_p11 = scmp.lt.s32.totalorder %s1141_s12, 3 }
  0x2e   : > { %s1286_s8 = scalar_lea.hbm %s1655_s1, %s938_s23  ;;  %s142_s14 = scalar_lea.vmem [#allocation5], %s937_s24 }
  0x2f   : > { %p1277_p12 = pnand %p931_p9, %p157_p11  ;;  %s149_s16 = sshll.u32 %s142_s14, 4  ;;  %s1290_s16 = int_to_ptr.vmem [resolvable:$true] %s149_s16 }
  0x30   : > { %s139_s27 = scalar_lea.sflag [#allocation6], %s1226_s22  ;;  %s1045_s30 = scalar_lea.hbm %s1286_s8, 768 }
  0x31   : > { %p1046_p3 = scmp.ne.s32.totalorder %s1286_s8, %s1045_s30  ;;  %s1050_s23 = scalar_lea.hbm %s1655_s1, 1536 }
  0x32   : > { %p1051_p8 = scmp.lt.s32.totalorder %s1286_s8, %s1655_s1  ;;  %p1052_p10 = scmp.lt.s32.totalorder %s1050_s23, %s1045_s30 }
  0x33   : > { %p1048_p5 = pnand %p1046_p3, %p1019_p1 }
  0x34   : > { %p1053_p0 = por %p1052_p10, %p1051_p8 }
  0x35   : > { %p1049_p7 = pneg %p1048_p5 }
  0x37   : > { %p1054_p2 = pnand %p1053_p0, %p1049_p7 }
  0x39   : > { %1057 = shalt.err (!%p1054_p2)
}
  0x3a   : > { %s1058_s22 = scalar_lea.vmem %s1290_s16, 768  ;;  %s1146_s24 = smov [#allocation5]  }
  0x3b   : > { %p1059_p4 = scmp.ne.s32.totalorder %s1290_s16, %s1058_s22  ;;  %s1063_s6 = sshll.u32 %s1146_s24, 4  ;;  %s1064_s6 = int_to_ptr.vmem [resolvable:$false] %s1063_s6 }
  0x3c   : > { %s1065_s7 = scalar_lea.vmem %s1064_s6, 1536  ;;  %p1066_p3 = scmp.lt.s32.totalorder %s1290_s16, %s1064_s6 }
  0x3d   : > { %p1061_p9 = pnand %p1059_p4, %p1019_p1  ;;  %p1067_p5 = scmp.lt.s32.totalorder %s1065_s7, %s1058_s22 }
  0x3f   : > { %p1062_p11 = pneg %p1061_p9  ;;  %p1068_p6 = por %p1067_p5, %p1066_p3 }
  0x41   : > { %p1069_p8 = pnand %p1068_p6, %p1062_p11 }
  0x43   : > { %1072 = shalt.err (!%p1069_p8)
}
  0x44   : > { %954 = dma.hbm_to_vmem [thread:$0]  (!%p1237_p13), %s1286_s8, 768, %s1290_s16, %s139_s27, %s1144_s29, %s1144_s29, %s1145_s4  }
  0x45   : > { %161 = sbr.rel (%p1277_p12) target bundleno = 1434 (0x59a), region = 28  ;;  %s1321_s14 = sand.u32 (!%p1277_p12), 1, %s1133_s10  }
  0x46   : > { %s941_s30 = smul.u32 (!%p1277_p12), 48, %s1321_s14  ;;  %s164_s3 = scalar_lea.sflag (!%p1277_p12), [#allocation3], %s1321_s14 }
  0x47   : > { %p1664_p6 = scmp.ne.s32.totalorder (!%p1277_p12), %s1659_s19, 0 }
  0x48   : > { %s167_s17 = scalar_lea.vmem (!%p1277_p12), [#allocation2], %s941_s30 }
  0x4a   : > { %1116 = dma.done.wait (%p1664_p6), %s164_s3, 768  }
  0x4b   : > { %1118 = vsyncadd (%p1664_p6), %s164_s3, 4294966528  ;;  %s173_s28 = scalar_lea.sflag [#allocation6], %s1321_s14  ;;  %s176_s29 = scalar_lea.vmem [#allocation5], %s941_s30 }
  0x4c   : > { %1120 = dma.done.wait (%p1664_p6), %s173_s28, 768  }
  0x4d   : > { %1122 = vsyncadd (%p1664_p6), %s173_s28, 4294966528  ;;  %v285_v0 = vld [vmem:[%s167_s17] sm:$0xff]  ;;  %v287_v1 = vld [vmem:[%s167_s17 + $0x10] sm:$0xff]  ;;  %v202_v16 = vlaneseq  ;;  %s1147_s19 = smov 16   ;;  %vm310_vm1 = vcmask 1047680   ;;  %s1148_s4 = smov 127  }
  0x4e   : > { %v289_v2 = vld [vmem:[%s167_s17 + $0x20] sm:$0xff]  ;;  %v291_v3 = vmul.f32 65.481, %v285_v0  ;;  %v293_v4 = vmul.f32 128.553, %v287_v1  ;;  %v519_v7 = vld [vmem:[%s176_s29 + $0x10] sm:$0xff] }
  0x4f   : > { %v297_v5 = vmul.f32 24.966, %v289_v2  ;;  %v517_v6 = vld [vmem:[%s176_s29] sm:$0xff]  ;;  %v525_v11 = vmul.f32 128.553, %v519_v7  ;;  %v286_v13 = vld [vmem:[%s167_s17 + $0x8] sm:$0xff] }
  0x50   : > { %v521_v8 = vld [vmem:[%s176_s29 + $0x20] sm:$0xff]  ;;  %v295_v9 = vadd.f32 %v293_v4, %v291_v3  ;;  %v523_v10 = vmul.f32 65.481, %v517_v6  ;;  %v288_v14 = vld [vmem:[%s167_s17 + $0x18] sm:$0xff]  ;;  %v290_v15 = vld [vmem:[%s167_s17 + $0x28] sm:$0xff]  ;;  %v1337_v31 = vshrl.u32 %v202_v16, 7 }
  0x51   : > { %v529_v12 = vmul.f32 24.966, %v521_v8  ;;  %v292_v19 = vmul.f32 65.481, %v286_v13  ;;  %v294_v20 = vmul.f32 128.553, %v288_v14 }
  0x52   : > { %v299_v17 = vadd.f32 %v297_v5, %v295_v9  ;;  %v527_v18 = vadd.f32 %v525_v11, %v523_v10  ;;  %v518_v21 = vld [vmem:[%s176_s29 + $0x8] sm:$0xff]  ;;  %v520_v22 = vld [vmem:[%s176_s29 + $0x18] sm:$0xff]  ;;  %v298_v23 = vmul.f32 24.966, %v290_v15  ;;  %vm305_vm0 = vcmp.lt.s32.totalorder %v1337_v31, 7  ;;  %s1150_s5 = smov 2  }
  0x53   : > { %v522_v24 = vld [vmem:[%s176_s29 + $0x28] sm:$0xff]  ;;  %v524_v25 = vmul.f32 65.481, %v518_v21  ;;  %v296_v28 = vadd.f32 %v294_v20, %v292_v19  ;;  %v526_v29 = vmul.f32 128.553, %v520_v22  ;;  %vm400_vm4 = vcmp.lt.s32.totalorder %v1337_v31, 6 }
  0x54   : > { %v1334_v26 = vadd.f32 16.0, %v299_v17  ;;  %v531_v27 = vadd.f32 %v529_v12, %v527_v18  ;;  %v530_v30 = vmul.f32 24.966, %v522_v24  ;;  %vm393_vm5 = vcmp.lt.s32.totalorder %v1337_v31, 2  ;;  %s1151_s8 = smov 14   ;;  %s1152_s16 = smov 12  }
  0x55   : > { %v300_v33 = vadd.f32 %v298_v23, %v296_v28  ;;  %v528_v34 = vadd.f32 %v526_v29, %v524_v25  ;;  %s1153_s27 = smov 114   ;;  %s1154_s23 = smov 126  }
  0x56   : > { %311 = vrot.lane.b32.xlu0 %v1334_v26, %s1147_s19  ;;  %v1341_v32 = vadd.f32 16.0, %v531_v27  ;;  %v303_v37 = vrot.slane %v1334_v26, 1  ;;  %s932_s25 = sshll.u32 %s1321_s14, 3  ;;  %s934_s26 = sshll.u32 %s1192_s13, 7 }
  0x57   : > { %v1345_v35 = vadd.f32 16.0, %v300_v33  ;;  %v532_v36 = vadd.f32 %v530_v30, %v528_v34  ;;  %v1407_v30 = vand.u32 127, %v202_v16  ;;  %v1149_v16 = vmov 0.0   ;;  %s201_s22 = scalar_lea.vmem [#allocation7], %s932_s25  ;;  %s1617_s30 = scalar_lea.hbm %s1656_s2, %s934_s26 }
  0x58   : > { %541 = vrot.lane.b32.xlu1 %v1341_v32, %s1147_s19  ;;  %v535_v40 = vrot.slane %v1341_v32, 1  ;;  %s833_s24 = sshll.u32 %s201_s22, 4  ;;  %s820_s3 = scalar_lea.sflag [#allocation4], %s1321_s14  ;;  %s834_s24 = int_to_ptr.vmem [resolvable:$true] %s833_s24 }
  0x59   : > { %v1351_v38 = vadd.f32 16.0, %v532_v36  ;;  %v304_v39 = vrot.slane %v1345_v35, 1  ;;  %vm241_vm2 = vcmp.le.s32.totalorder %v1407_v30, 13  ;;  %vm239_vm7 = vcmp.ge.s32.totalorder %v1407_v30, 2  ;;  %s1073_s17 = scalar_lea.vmem %s834_s24, 128  ;;  %p1665_p1 = scmp.ne.s32.totalorder %s1660_s20, 0 }
  0x5a   : > { %314 = vrot.lane.b32.xlu0 %v1345_v35, %s1147_s19  ;;  %p1074_p13 = scmp.ne.s32.totalorder %s834_s24, %s1073_s17  ;;  %s1155_s13 = smov [#allocation7]  }
  0x5b   : > { %v306_v41 = vsel %vm305_vm0, %v303_v37, %v304_v39  ;;  %v536_v42 = vrot.slane %v1351_v38, 1  ;;  %v307_v43 = vsel %vm305_vm0, %v304_v39, %v303_v37  ;;  %s1077_s28 = sshll.u32 %s1155_s13, 4  ;;  %s1078_s28 = int_to_ptr.vmem [resolvable:$false] %s1077_s28 }
  0x5c   : > { %544 = vrot.lane.b32.xlu1 %v1351_v38, %s1147_s19  ;;  %v308_v15 = vadd.f32 %v306_v41, %v1334_v26  ;;  %v309_v20 = vadd.f32 %v307_v43, %v1345_v35  ;;  %p1075_p12 = pnand %p1074_p13, %p1665_p1  ;;  %s1079_s29 = scalar_lea.vmem %s1078_s28, 256 }
  0x5d   : > { %v537_v44 = vsel %vm305_vm0, %v535_v40, %v536_v42  ;;  %v1360_v45 = vsel %vm305_vm0, %v536_v42, %v535_v40  ;;  %v242_v40 = vsel %vm241_vm2, 1.0, %v1149_v16  ;;  %v1426_v42 = vadd.s32 8, %v1337_v31  ;;  %p1080_p10 = scmp.lt.s32.totalorder %s834_s24, %s1078_s28  ;;  %p1081_p0 = scmp.lt.s32.totalorder %s1079_s29, %s1073_s17 }
  0x5e   : > { %333 = vrot.lane.b32.xlu0 %v306_v41, %s1147_s19  ;;  %v539_v21 = vadd.f32 %v537_v44, %v1341_v32  ;;  %v540_v25 = vadd.f32 %v1360_v45, %v1351_v38  ;;  %p1076_p7 = pneg %p1075_p12 }
  0x5f   : > { %p1082_p2 = por %p1081_p0, %p1080_p10 }
  0x60   : > { %336 = vrot.lane.b32.xlu1 %v307_v43, %s1147_s19 }
  0x61   : > { %p1083_p4 = pnand %p1082_p2, %p1076_p7 }
  0x62   : > { %563 = vrot.lane.b32.xlu0 %v537_v44, %s1147_s19 }
  0x64   : > { %566 = vrot.lane.b32.xlu1 %v1360_v45, %s1147_s19 }
  0xc8   : > { %v312_v46 = vpop.permute.xlu0 %311 }
  0xc9   : > { %v313_v47 = vsel %vm310_vm1, %v312_v46, %v1334_v26 }
  0xca   : > { %317 = vrot.lane.b32.xlu0 %v313_v47, %s1147_s19  ;;  %v542_v48 = vpop.permute.xlu1 %541 }
  0xcb   : > { %v543_v49 = vsel %vm310_vm1, %v542_v48, %v1341_v32 }
  0xcc   : > { %v315_v50 = vpop.permute.xlu0 %314 }
  0xcd   : > { %v316_v51 = vsel %vm310_vm1, %v315_v50, %v1345_v35 }
  0xce   : > { %319 = vrot.lane.b32.xlu1 %v316_v51, %s1147_s19  ;;  %547 = vrot.lane.b32.xlu0 %v543_v49, %s1147_s19  ;;  %v545_v52 = vpop.permute.xlu1 %544 }
  0xcf   : > { %v546_v53 = vsel %vm310_vm1, %v545_v52, %v1351_v38 }
  0xd0   : > { %v334_v54 = vpop.permute.xlu0 %333 }
  0xd1   : > { %v335_v55 = vsel %vm310_vm1, %v334_v54, %v306_v41 }
  0xd2   : > { %549 = vrot.lane.b32.xlu1 %v546_v53, %s1147_s19  ;;  %339 = vrot.lane.b32.xlu0 %v335_v55, %s1147_s19  ;;  %v337_v56 = vpop.permute.xlu1 %336 }
  0xd3   : > { %v338_v57 = vsel %vm310_vm1, %v337_v56, %v307_v43 }
  0xd4   : > { %v564_v58 = vpop.permute.xlu0 %563 }
  0xd5   : > { %v565_v59 = vsel %vm310_vm1, %v564_v58, %v537_v44 }
  0xd6   : > { %341 = vrot.lane.b32.xlu1 %v338_v57, %s1147_s19  ;;  %569 = vrot.lane.b32.xlu0 %v565_v59, %s1147_s19  ;;  %v567_v60 = vpop.permute.xlu1 %566 }
  0xd7   : > { %v568_v61 = vsel %vm310_vm1, %v567_v60, %v1360_v45 }
  0xda   : > { %571 = vrot.lane.b32.xlu1 %v568_v61, %s1147_s19 }
 0x13c   : > { %v318_v62 = vpop.permute.xlu0 %317 }
 0x13d   : > { %v321_v63 = vsel %vm310_vm1, %v318_v62, %v1334_v26 }
 0x13e   : > { %325 = vrot.lane.b32.xlu0 %v321_v63, %s1148_s4 }
 0x140   : > { %v320_v0 = vpop.permute.xlu1 %319  ;;  %v548_v1 = vpop.permute.xlu0 %547 }
 0x141   : > { %v322_v2 = vsel %vm310_vm1, %v320_v0, %v1345_v35  ;;  %v551_v3 = vsel %vm310_vm1, %v548_v1, %v1341_v32 }
 0x142   : > { %327 = vrot.lane.b32.xlu1 %v322_v2, %s1148_s4  ;;  %555 = vrot.lane.b32.xlu0 %v551_v3, %s1148_s4 }
 0x144   : > { %v550_v4 = vpop.permute.xlu1 %549  ;;  %v340_v5 = vpop.permute.xlu0 %339 }
 0x145   : > { %v552_v6 = vsel %vm310_vm1, %v550_v4, %v1351_v38  ;;  %v343_v7 = vsel %vm310_vm1, %v340_v5, %v306_v41 }
 0x146   : > { %557 = vrot.lane.b32.xlu1 %v552_v6, %s1148_s4  ;;  %347 = vrot.lane.b32.xlu0 %v343_v7, %s1148_s4 }
 0x148   : > { %v342_v8 = vpop.permute.xlu1 %341  ;;  %v570_v9 = vpop.permute.xlu0 %569 }
 0x149   : > { %v344_v10 = vsel %vm310_vm1, %v342_v8, %v307_v43  ;;  %v573_v11 = vsel %vm310_vm1, %v570_v9, %v537_v44  ;;  %v216_v43 = vand.u32 15, %v1426_v42 }
 0x14a   : > { %349 = vrot.lane.b32.xlu1 %v344_v10, %s1148_s4  ;;  %577 = vrot.lane.b32.xlu0 %v573_v11, %s1148_s4 }
 0x14b   : > { %vm236_vm3 = vcmp.le.s32.totalorder %v216_v43, 13 }
 0x14c   : > { %v572_v12 = vpop.permute.xlu1 %571  ;;  %v1436_v48 = vsel %vm236_vm3, 1.0, %v1149_v16  ;;  %vm769_vm3 = vcmask 130048  }
 0x14d   : > { %v574_v13 = vsel %vm310_vm1, %v572_v12, %v1360_v45  ;;  %v209_v45 = vand.u32 15, %v1337_v31 }
 0x14e   : > { %579 = vrot.lane.b32.xlu1 %v574_v13, %s1148_s4 }
 0x14f   : > { %vm231_vm6 = vcmp.ge.s32.totalorder %v209_v45, 2 }
 0x150   : > { %v1452_v58 = vsel %vm231_vm6, 1.0, %v1149_v16 }
 0x1b0   : > { %v326_v14 = vpop.permute.xlu0 %325 }
 0x1b1   : > { %v331_v19 = vadd.f32 %v326_v14, %v308_v15  ;;  %v240_v15 = vsel %vm239_vm7, 1.0, %v1149_v16 }
 0x1b4   : > { %v328_v17 = vpop.permute.xlu1 %327  ;;  %v556_v18 = vpop.permute.xlu0 %555 }
 0x1b5   : > { %v332_v27 = vadd.f32 %v328_v17, %v309_v20  ;;  %v561_v28 = vadd.f32 %v556_v18, %v539_v21 }
 0x1b8   : > { %v558_v22 = vpop.permute.xlu1 %557  ;;  %v348_v23 = vpop.permute.xlu0 %347 }
 0x1b9   : > { %v353_v24 = vadd.f32 %v348_v23, %v331_v19  ;;  %v562_v32 = vadd.f32 %v558_v22, %v540_v25 }
 0x1bb   : > { %v1404_v29 = vmul.f32 0.25, %v353_v24 }
 0x1bc   : > { %v350_v26 = vpop.permute.xlu1 %349  ;;  %v578_v33 = vpop.permute.xlu0 %577 }
 0x1bd   : > { %v354_v34 = vadd.f32 %v350_v26, %v332_v27  ;;  %v583_v36 = vadd.f32 %v578_v33, %v561_v28  ;;  %357 = vrot.lane.b32.xlu0 %v1404_v29, %s1147_s19  ;;  %v398_v46 = vrot.slane %v1404_v29, 2  ;;  %v391_v53 = vrot.slane %v1404_v29, 6 }
 0x1bf   : > { %v1411_v35 = vmul.f32 0.25, %v354_v34  ;;  %v1413_v37 = vmul.f32 0.25, %v583_v36 }
 0x1c0   : > { %v580_v38 = vpop.permute.xlu1 %579 }
 0x1c1   : > { %v584_v39 = vadd.f32 %v580_v38, %v562_v32  ;;  %360 = vrot.lane.b32.xlu1 %v1411_v35, %s1147_s19  ;;  %587 = vrot.lane.b32.xlu0 %v1413_v37, %s1147_s19  ;;  %v399_v44 = vrot.slane %v1411_v35, 2  ;;  %v392_v49 = vrot.slane %v1411_v35, 6  ;;  %v619_v54 = vrot.slane %v1413_v37, 2 }
 0x1c2   : > { %v613_v1 = vrot.slane %v1413_v37, 6 }
 0x1c3   : > { %v1421_v41 = vmul.f32 0.25, %v584_v39  ;;  %v402_v52 = vsel %vm400_vm4, %v399_v44, %v398_v46  ;;  %v395_v59 = vsel %vm393_vm5, %v392_v49, %v391_v53  ;;  %v394_v0 = vsel %vm393_vm5, %v391_v53, %v392_v49 }
 0x1c4   : > { %v404_v57 = vmul.f32 %v402_v52, %v1436_v48  ;;  %v396_v4 = vmul.f32 %v395_v59, %v1452_v58  ;;  %v401_v8 = vsel %vm400_vm4, %v398_v46, %v399_v44 }
 0x1c5   : > { %590 = vrot.lane.b32.xlu1 %v1421_v41, %s1147_s19  ;;  %376 = vrot.lane.b32.xlu0 %v242_v40, %s1150_s5  ;;  %v620_v50 = vrot.slane %v1421_v41, 2  ;;  %v614_v62 = vrot.slane %v1421_v41, 6 }
 0x1c6   : > { %v1468_v3 = vsub.f32 %v394_v0, %v404_v57  ;;  %v1483_v10 = vsub.f32 %v396_v4, %v401_v8 }
 0x1c7   : > { %v622_v63 = vsel %vm400_vm4, %v620_v50, %v619_v54  ;;  %v616_v7 = vsel %vm393_vm5, %v614_v62, %v613_v1  ;;  %v615_v9 = vsel %vm393_vm5, %v613_v1, %v614_v62  ;;  %v621_v13 = vsel %vm400_vm4, %v619_v54, %v620_v50 }
 0x1c8   : > { %v624_v5 = vmul.f32 %v622_v63, %v1436_v48  ;;  %v617_v12 = vmul.f32 %v616_v7, %v1452_v58 }
 0x1ca   : > { %v1485_v11 = vsub.f32 %v615_v9, %v624_v5  ;;  %v1494_v14 = vsub.f32 %v617_v12, %v621_v13 }
 0x22f   : > { %v358_v47 = vpop.permute.xlu0 %357 }
 0x230   : > { %v359_v51 = vsel %vm310_vm1, %v358_v47, %v1404_v29 }
 0x231   : > { %363 = vrot.lane.b32.xlu0 %v359_v51, %s1147_s19 }
 0x233   : > { %v361_v55 = vpop.permute.xlu1 %360  ;;  %v588_v56 = vpop.permute.xlu0 %587 }
 0x234   : > { %v362_v60 = vsel %vm310_vm1, %v361_v55, %v1411_v35  ;;  %v589_v61 = vsel %vm310_vm1, %v588_v56, %v1413_v37 }
 0x235   : > { %365 = vrot.lane.b32.xlu1 %v362_v60, %s1147_s19  ;;  %593 = vrot.lane.b32.xlu0 %v589_v61, %s1147_s19 }
 0x237   : > { %v591_v2 = vpop.permute.xlu1 %590  ;;  %v1501_v17 = vpop.permute.xlu0 %376 }
 0x238   : > { %v592_v6 = vsel %vm310_vm1, %v591_v2, %v1421_v41 }
 0x239   : > { %595 = vrot.lane.b32.xlu1 %v592_v6, %s1147_s19  ;;  %452 = vrot.lane.b32.xlu0 %v1468_v3, %s1147_s19 }
 0x23d   : > { %449 = vrot.lane.b32.xlu1 %v1483_v10, %s1147_s19  ;;  %672 = vrot.lane.b32.xlu0 %v1485_v11, %s1147_s19 }
 0x241   : > { %669 = vrot.lane.b32.xlu1 %v1494_v14, %s1147_s19 }
 0x245   : > { %370 = vrot.lane.b32.xlu1 %v240_v15, %s1151_s8 }
 0x2a3   : > { %v364_v18 = vpop.permute.xlu0 %363 }
 0x2a4   : > { %v367_v28 = vsel %vm310_vm1, %v364_v18, %v1404_v29 }
 0x2a5   : > { %v379_v34 = vmul.f32 %v1501_v17, %v367_v28 }
 0x2a7   : > { %v366_v19 = vpop.permute.xlu1 %365  ;;  %v594_v20 = vpop.permute.xlu0 %593 }
 0x2a8   : > { %v368_v23 = vsel %vm310_vm1, %v366_v19, %v1411_v35  ;;  %v597_v32 = vsel %vm310_vm1, %v594_v20, %v1413_v37 }
 0x2a9   : > { %v380_v25 = vmul.f32 %v1501_v17, %v368_v23  ;;  %v601_v29 = vmul.f32 %v597_v32, %v1501_v17 }
 0x2ab   : > { %v596_v21 = vpop.permute.xlu1 %595  ;;  %v453_v22 = vpop.permute.xlu0 %452 }
 0x2ac   : > { %v454_v24 = vsel %vm310_vm1, %v453_v22, %v1468_v3  ;;  %v598_v26 = vsel %vm310_vm1, %v596_v21, %v1421_v41 }
 0x2ad   : > { %457 = vrot.lane.b32.xlu1 %v454_v24, %s1147_s19  ;;  %v602_v36 = vmul.f32 %v598_v26, %v1501_v17 }
 0x2af   : > { %v450_v27 = vpop.permute.xlu1 %449  ;;  %v673_v35 = vpop.permute.xlu0 %672 }
 0x2b0   : > { %v451_v33 = vsel %vm310_vm1, %v450_v27, %v1483_v10  ;;  %v674_v38 = vsel %vm310_vm1, %v673_v35, %v1485_v11 }
 0x2b1   : > { %455 = vrot.lane.b32.xlu0 %v451_v33, %s1147_s19  ;;  %385 = vrot.lane.b32.xlu1 %v380_v25, %s1152_s16 }
 0x2b3   : > { %v670_v39 = vpop.permute.xlu1 %669 }
 0x2b4   : > { %v671_v40 = vsel %vm310_vm1, %v670_v39, %v1494_v14 }
 0x2b5   : > { %383 = vrot.lane.b32.xlu0 %v379_v34, %s1152_s16  ;;  %607 = vrot.lane.b32.xlu1 %v602_v36, %s1152_s16 }
 0x2b7   : > { %v371_v41 = vpop.permute.xlu1 %370 }
 0x2b8   : > { %v374_v59 = vmul.f32 %v371_v41, %v368_v23  ;;  %v600_v0 = vmul.f32 %v598_v26, %v371_v41  ;;  %v373_v1 = vmul.f32 %v371_v41, %v367_v28  ;;  %v599_v5 = vmul.f32 %v597_v32, %v371_v41 }
 0x2b9   : > { %605 = vrot.lane.b32.xlu0 %v601_v29, %s1152_s16  ;;  %677 = vrot.lane.b32.xlu1 %v674_v38, %s1147_s19 }
 0x2bd   : > { %675 = vrot.lane.b32.xlu0 %v671_v40, %s1147_s19 }
 0x31f   : > { %v458_v44 = vpop.permute.xlu1 %457 }
 0x320   : > { %v460_v37 = vsel %vm310_vm1, %v458_v44, %v1468_v3 }
 0x321   : > { %v462_v46 = vmul.f32 %v460_v37, %v371_v41  ;;  %v474_v6 = vmul.f32 %v460_v37, %v1501_v17 }
 0x323   : > { %v386_v47 = vpop.permute.xlu1 %385  ;;  %467 = vrot.lane.b32.xlu1 %v462_v46, %s1153_s27  ;;  %v456_v49 = vpop.permute.xlu0 %455 }
 0x324   : > { %v459_v50 = vsel %vm310_vm1, %v456_v49, %v1483_v10  ;;  %v1538_v62 = vsub.f32 %v374_v59, %v386_v47 }
 0x325   : > { %v461_v51 = vmul.f32 %v459_v50, %v371_v41  ;;  %v473_v8 = vmul.f32 %v459_v50, %v1501_v17 }
 0x327   : > { %v608_v52 = vpop.permute.xlu1 %607  ;;  %465 = vrot.lane.b32.xlu0 %v461_v51, %s1153_s27  ;;  %v384_v53 = vpop.permute.xlu0 %383 }
 0x328   : > { %v1543_v2 = vsub.f32 %v600_v0, %v608_v52  ;;  %v1545_v4 = vsub.f32 %v373_v1, %v384_v53 }
 0x32b   : > { %v678_v54 = vpop.permute.xlu1 %677  ;;  %v606_v55 = vpop.permute.xlu0 %605 }
 0x32c   : > { %v680_v56 = vsel %vm310_vm1, %v678_v54, %v1485_v11  ;;  %v1552_v7 = vsub.f32 %v599_v5, %v606_v55 }
 0x32d   : > { %v682_v57 = vmul.f32 %v680_v56, %v371_v41  ;;  %v694_v9 = vmul.f32 %v680_v56, %v1501_v17 }
 0x32f   : > { %687 = vrot.lane.b32.xlu1 %v682_v57, %s1153_s27  ;;  %v676_v60 = vpop.permute.xlu0 %675 }
 0x330   : > { %v679_v61 = vsel %vm310_vm1, %v676_v60, %v1494_v14 }
 0x331   : > { %v681_v63 = vmul.f32 %v679_v61, %v371_v41  ;;  %v693_v12 = vmul.f32 %v679_v61, %v1501_v17 }
 0x333   : > { %411 = vrot.lane.b32.xlu1 %v1538_v62, %s1153_s27  ;;  %685 = vrot.lane.b32.xlu0 %v681_v63, %s1153_s27 }
 0x337   : > { %631 = vrot.lane.b32.xlu1 %v1543_v2, %s1153_s27  ;;  %409 = vrot.lane.b32.xlu0 %v1545_v4, %s1153_s27 }
 0x33b   : > { %479 = vrot.lane.b32.xlu1 %v474_v6, %s1154_s23  ;;  %629 = vrot.lane.b32.xlu0 %v1552_v7, %s1153_s27 }
 0x33f   : > { %699 = vrot.lane.b32.xlu1 %v694_v9, %s1154_s23  ;;  %477 = vrot.lane.b32.xlu0 %v473_v8, %s1154_s23 }
 0x343   : > { %697 = vrot.lane.b32.xlu0 %v693_v12, %s1154_s23 }
 0x395   : > { %v468_v13 = vpop.permute.xlu1 %467 }
 0x396   : > { %v472_v29 = vadd.f32 %v468_v13, %v1468_v3 }
 0x399   : > { %v466_v15 = vpop.permute.xlu0 %465 }
 0x39a   : > { %v471_v44 = vadd.f32 %v466_v15, %v1483_v10 }
 0x3a1   : > { %v688_v18 = vpop.permute.xlu1 %687 }
 0x3a2   : > { %v692_v10 = vadd.f32 %v688_v18, %v1485_v11  ;;  %v275_v11 = vand.u32 1, %v1407_v30 }
 0x3a4   : > { %vm283_vm8 = vcmp.eq.s32.totalorder %v275_v11, 0 }
 0x3a5   : > { %v412_v19 = vpop.permute.xlu1 %411  ;;  %v686_v20 = vpop.permute.xlu0 %685 }
 0x3a6   : > { %v416_v23 = vrot.slane %v412_v19, 6  ;;  %v432_v24 = vrot.slane %v412_v19, 2  ;;  %v691_v53 = vadd.f32 %v686_v20, %v1494_v14 }
 0x3a9   : > { %v632_v21 = vpop.permute.xlu1 %631  ;;  %v410_v22 = vpop.permute.xlu0 %409 }
 0x3aa   : > { %v415_v25 = vrot.slane %v410_v22, 6  ;;  %v431_v27 = vrot.slane %v410_v22, 2  ;;  %v636_v33 = vrot.slane %v632_v21, 6  ;;  %v652_v34 = vrot.slane %v632_v21, 2 }
 0x3ac   : > { %v433_v28 = vsel %vm400_vm4, %v431_v27, %v432_v24  ;;  %v417_v26 = vsel %vm393_vm5, %v415_v25, %v416_v23  ;;  %v418_v40 = vsel %vm393_vm5, %v416_v23, %v415_v25  ;;  %v434_v41 = vsel %vm400_vm4, %v432_v24, %v431_v27 }
 0x3ad   : > { %439 = vrot.lane.b32.xlu0 %v433_v28, %s1151_s8  ;;  %425 = vrot.lane.b32.xlu1 %v417_v26, %s1151_s8  ;;  %v630_v17 = vpop.permute.xlu0 %629  ;;  %v480_v36 = vpop.permute.xlu1 %479  ;;  %v419_v47 = vmul.f32 %v418_v40, %v1452_v58  ;;  %v436_v49 = vmul.f32 %v434_v41, %v1436_v48 }
 0x3ae   : > { %v635_v32 = vrot.slane %v630_v17, 6  ;;  %v651_v35 = vrot.slane %v630_v17, 2  ;;  %v484_v3 = vadd.f32 %v480_v36, %v472_v29 }
 0x3b0   : > { %v653_v38 = vsel %vm400_vm4, %v651_v35, %v652_v34  ;;  %v637_v39 = vsel %vm393_vm5, %v635_v32, %v636_v33  ;;  %v638_v50 = vsel %vm393_vm5, %v636_v33, %v635_v32  ;;  %v654_v52 = vsel %vm400_vm4, %v652_v34, %v651_v35 }
 0x3b1   : > { %659 = vrot.lane.b32.xlu0 %v653_v38, %s1151_s8  ;;  %645 = vrot.lane.b32.xlu1 %v637_v39, %s1151_s8  ;;  %v478_v37 = vpop.permute.xlu0 %477  ;;  %v700_v51 = vpop.permute.xlu1 %699  ;;  %v486_v55 = vmul.f32 0.33333334, %v484_v3  ;;  %v639_v56 = vmul.f32 %v638_v50, %v1452_v58  ;;  %v656_v61 = vmul.f32 %v654_v52, %v1436_v48  ;;  %v284_v48 = vsel %vm283_vm8, 1.0, %v1149_v16 }
 0x3b2   : > { %v483_v46 = vadd.f32 %v478_v37, %v471_v44  ;;  %v704_v57 = vadd.f32 %v700_v51, %v692_v10 }
 0x3b3   : > { %v490_v14 = vmul.f32 %v486_v55, %v486_v55 }
 0x3b4   : > { %v485_v59 = vmul.f32 0.33333334, %v483_v46  ;;  %v706_v63 = vmul.f32 0.33333334, %v704_v57 }
 0x3b5   : > { %423 = vrot.lane.b32.xlu0 %v419_v47, %s1151_s8  ;;  %441 = vrot.lane.b32.xlu1 %v436_v49, %s1151_s8  ;;  %v698_v54 = vpop.permute.xlu0 %697 }
 0x3b6   : > { %v703_v60 = vadd.f32 %v698_v54, %v691_v53  ;;  %v489_v0 = vmul.f32 %v485_v59, %v485_v59  ;;  %v710_v58 = vmul.f32 %v706_v63, %v706_v63 }
 0x3b8   : > { %v705_v1 = vmul.f32 0.33333334, %v703_v60 }
 0x3b9   : > { %643 = vrot.lane.b32.xlu0 %v639_v56, %s1151_s8  ;;  %661 = vrot.lane.b32.xlu1 %v656_v61, %s1151_s8 }
 0x3ba   : > { %v709_v5 = vmul.f32 %v705_v1, %v705_v1 }
 0x3bd   : > { %495 = vrot.lane.b32.xlu1 %v490_v14, %s1151_s8  ;;  %493 = vrot.lane.b32.xlu0 %v489_v0, %s1151_s8 }
 0x3c1   : > { %715 = vrot.lane.b32.xlu1 %v710_v58, %s1151_s8  ;;  %713 = vrot.lane.b32.xlu0 %v709_v5, %s1151_s8 }
 0x3c5   : > { %756 = vrot.lane.b32.xlu0 %v284_v48, %s1151_s8 }
 0x41f   : > { %v426_v30 = vpop.permute.xlu1 %425  ;;  %v440_v6 = vpop.permute.xlu0 %439 }
 0x420   : > { %v430_v12 = vadd.f32 %v426_v30, %v1538_v62 }
 0x423   : > { %v646_v8 = vpop.permute.xlu1 %645  ;;  %v660_v9 = vpop.permute.xlu0 %659 }
 0x424   : > { %v650_v20 = vadd.f32 %v646_v8, %v1543_v2 }
 0x427   : > { %v442_v13 = vpop.permute.xlu1 %441  ;;  %v424_v15 = vpop.permute.xlu0 %423 }
 0x428   : > { %v446_v18 = vadd.f32 %v442_v13, %v430_v12  ;;  %v429_v19 = vadd.f32 %v424_v15, %v1545_v4  ;;  %v254_v13 = vand.u32 1, %v216_v43  ;;  %v247_v15 = vand.u32 1, %v209_v45 }
 0x42a   : > { %v448_v21 = vmul.f32 0.33333334, %v446_v18  ;;  %v445_v22 = vadd.f32 %v440_v6, %v429_v19  ;;  %vm268_vm1 = vcmp.eq.s32.totalorder %v254_v13, 0  ;;  %vm267_vm2 = vcmp.eq.s32.totalorder %v247_v15, 0 }
 0x42b   : > { %v662_v23 = vpop.permute.xlu1 %661  ;;  %v644_v24 = vpop.permute.xlu0 %643 }
 0x42c   : > { %v666_v25 = vadd.f32 %v662_v23, %v650_v20  ;;  %v649_v27 = vadd.f32 %v644_v24, %v1552_v7  ;;  %v447_v28 = vmul.f32 0.33333334, %v445_v22  ;;  %v488_v26 = vmul.f32 %v448_v21, %v448_v21 }
 0x42d   : > { %v270_v22 = vsel %vm268_vm1, 1.0, %v1149_v16 }
 0x42e   : > { %v668_v17 = vmul.f32 0.33333334, %v666_v25  ;;  %v665_v33 = vadd.f32 %v660_v9, %v649_v27  ;;  %v487_v34 = vmul.f32 %v447_v28, %v447_v28  ;;  %v269_v25 = vsel %vm267_vm2, 1.0, %v1149_v16 }
 0x42f   : > { %v496_v62 = vpop.permute.xlu1 %495  ;;  %v494_v36 = vpop.permute.xlu0 %493 }
 0x430   : > { %v500_v32 = vadd.f32 %v496_v62, %v488_v26  ;;  %v499_v35 = vadd.f32 %v494_v36, %v487_v34  ;;  %v667_v29 = vmul.f32 0.33333334, %v665_v33  ;;  %v708_v4 = vmul.f32 %v668_v17, %v668_v17 }
 0x432   : > { %v502_v38 = vadd.f32 1e-12, %v500_v32  ;;  %v501_v2 = vadd.f32 1e-12, %v499_v35  ;;  %v707_v39 = vmul.f32 %v667_v29, %v667_v29 }
 0x433   : > { %v716_v40 = vpop.permute.xlu1 %715  ;;  %v714_v41 = vpop.permute.xlu0 %713 }
 0x434   : > { %1003 = vrsqrt.f32 %v502_v38  ;;  %v720_v44 = vadd.f32 %v716_v40, %v708_v4  ;;  %v719_v37 = vadd.f32 %v714_v41, %v707_v39  ;;  %vm512_vm9 = vcmp.eq.f32.partialorder %v502_v38, inf }
 0x435   : > { %1005 = vrsqrt.f32 %v501_v2  ;;  %vm505_vm10 = vcmp.eq.f32.partialorder %v501_v2, inf  ;;  %vm507_vm11 = vcmp.eq.f32.partialorder %v501_v2, 0.0  ;;  %v515_v53 = vand.u32 2147483648, %v502_v38 }
 0x436   : > { %v722_v7 = vadd.f32 1e-12, %v720_v44  ;;  %v721_v3 = vadd.f32 1e-12, %v719_v37  ;;  %v508_v55 = vand.u32 2147483648, %v501_v2  ;;  %vm514_vm12 = vcmp.eq.f32.partialorder %v502_v38, 0.0 }
 0x437   : > { %v757_v26 = vpop.permute.xlu0 %756 }
 0x438   : > { %1007 = vrsqrt.f32 %v722_v7  ;;  %vm725_vm13 = vcmp.eq.f32.partialorder %v721_v3, inf  ;;  %vm732_vm14 = vcmp.eq.f32.partialorder %v722_v7, inf  ;;  %v735_v60 = vand.u32 2147483648, %v722_v7 }
 0x439   : > { %1009 = vrsqrt.f32 %v721_v3  ;;  %v728_v11 = vand.u32 2147483648, %v721_v3  ;;  %vm734_vm15 = vcmp.eq.f32.partialorder %v722_v7, 0.0  ;;  %vm727_vm0 = vcmp.eq.f32.partialorder %v721_v3, 0.0 }
 0x441   : > { %v1004_v46 = vpop.eup %1003 }
 0x442   : > { %v1006_v47 = vpop.eup %1005  ;;  %v511_v49 = vmul.f32 %v1004_v46, %v502_v38 }
 0x443   : > { %v504_v50 = vmul.f32 %v1006_v47, %v501_v2 }
 0x444   : > { %v513_v51 = vsel %vm512_vm9, %v502_v38, %v511_v49 }
 0x445   : > { %v1008_v52 = vpop.eup %1007  ;;  %v506_v10 = vsel %vm505_vm10, %v501_v2, %v504_v50  ;;  %v516_v57 = vsel %vm514_vm12, %v515_v53, %v513_v51 }
 0x446   : > { %v1010_v54 = vpop.eup %1009  ;;  %v731_v56 = vmul.f32 %v1008_v52, %v722_v7  ;;  %v509_v61 = vsel %vm507_vm11, %v508_v55, %v506_v10  ;;  %v740_v58 = vmul.f32 %v516_v57, %v516_v57 }
 0x447   : > { %v724_v59 = vmul.f32 %v1010_v54, %v721_v3  ;;  %v739_v48 = vmul.f32 %v509_v61, %v509_v61 }
 0x448   : > { %v733_v14 = vsel %vm732_vm14, %v722_v7, %v731_v56 }
 0x449   : > { %v726_v63 = vsel %vm725_vm13, %v721_v3, %v724_v59  ;;  %v736_v0 = vsel %vm734_vm15, %v735_v60, %v733_v14 }
 0x44a   : > { %v729_v1 = vsel %vm727_vm0, %v728_v11, %v726_v63  ;;  %v742_v5 = vmul.f32 %v736_v0, %v736_v0  ;;  %v738_v18 = vsub.f32 %v516_v57, %v736_v0 }
 0x44b   : > { %v741_v30 = vmul.f32 %v729_v1, %v729_v1  ;;  %v737_v19 = vsub.f32 %v509_v61, %v729_v1 }
 0x44c   : > { %v744_v6 = vadd.f32 %v742_v5, %v740_v58  ;;  %v748_v20 = vmul.f32 %v738_v18, %v738_v18 }
 0x44d   : > { %v743_v8 = vadd.f32 %v741_v30, %v739_v48  ;;  %v747_v23 = vmul.f32 %v737_v19, %v737_v19 }
 0x44e   : > { %v746_v9 = vadd.f32 170.0, %v744_v6 }
 0x44f   : > { %v745_v12 = vadd.f32 170.0, %v743_v8 }
 0x450   : > { %1011 = vrcp.f32 %v746_v9 }
 0x451   : > { %1013 = vrcp.f32 %v745_v12 }
 0x45d   : > { %v1012_v21 = vpop.eup %1011 }
 0x45e   : > { %v1014_v24 = vpop.eup %1013  ;;  %v752_v27 = vmul.f32 %v1012_v21, %v748_v20 }
 0x45f   : > { %v751_v28 = vmul.f32 %v1014_v24, %v747_v23 }
 0x460   : > { %v754_v42 = vmul.f32 %v752_v27, %v270_v22 }
 0x461   : > { %v753_v43 = vmul.f32 %v751_v28, %v269_v25 }
 0x462   : > { %v760_v17 = vmul.f32 %v757_v26, %v754_v42 }
 0x463   : > { %v759_v31 = vmul.f32 %v757_v26, %v753_v43 }
 0x464   : > { %765 = vrot.lane.b32.xlu0 %v760_v17, %s1153_s27  ;;  %v784_v45 = vmul.f32 %v760_v17, %v760_v17 }
 0x465   : > { %763 = vrot.lane.b32.xlu1 %v759_v31, %s1153_s27  ;;  %v783_v33 = vmul.f32 %v759_v31, %v759_v31 }
 0x468   : > { %789 = vrot.lane.b32.xlu0 %v784_v45, %s1153_s27 }
 0x469   : > { %787 = vrot.lane.b32.xlu1 %v783_v33, %s1153_s27 }
 0x4d6   : > { %v766_v34 = vpop.permute.xlu0 %765 }
 0x4d7   : > { %v764_v16 = vpop.permute.xlu1 %763  ;;  %v773_v62 = vsel %vm769_vm3, %v766_v34, 0.0 }
 0x4d8   : > { %774 = vadd.xlane.f32.xlu0 %v773_v62  ;;  %v770_v36 = vsel %vm769_vm3, %v764_v16, 0.0 }
 0x4d9   : > { %771 = vadd.xlane.f32.xlu1 %v770_v36 }
 0x4da   : > { %v790_v32 = vpop.permute.xlu0 %789 }
 0x4db   : > { %v788_v35 = vpop.permute.xlu1 %787  ;;  %v796_v29 = vsel %vm769_vm3, %v790_v32, 0.0 }
 0x4dc   : > { %v793_v4 = vsel %vm769_vm3, %v788_v35, 0.0 }
 0x4dd   : > { %797 = vadd.xlane.f32.xlu1 %v796_v29  ;;  %794 = vadd.xlane.f32.xlu0 %v793_v4 }
 0x561   : > { %v775_v38 = vpop.xlane.xlu0 %774 }
 0x562   : > { %v772_v2 = vpop.xlane.xlu1 %771 }
 0x563   : > { %v776_v39 = vadd.f32 %v775_v38, %v772_v2 }
 0x565   : > { %v777_v40 = vrot.slane %v776_v39, 4 }
 0x566   : > { %v795_v41 = vpop.xlane.xlu0 %794  ;;  %v798_v44 = vpop.xlane.xlu1 %797 }
 0x567   : > { %v778_v37 = vadd.f32 %v777_v40, %v776_v39  ;;  %v799_v7 = vadd.f32 %v798_v44, %v795_v41 }
 0x569   : > { %v779_v3 = vrot.slane %v778_v37, 2  ;;  %v800_v46 = vrot.slane %v799_v7, 4 }
 0x56b   : > { %v780_v47 = vadd.f32 %v779_v3, %v778_v37  ;;  %v801_v49 = vadd.f32 %v800_v46, %v799_v7 }
 0x56d   : > { %v781_v50 = vrot.slane %v780_v47, 1  ;;  %v802_v51 = vrot.slane %v801_v49, 2 }
 0x56f   : > { %v782_v52 = vadd.f32 %v781_v50, %v780_v47  ;;  %v803_v10 = vadd.f32 %v802_v51, %v801_v49 }
 0x571   : > { %v806_v53 = vmul.f32 %v782_v52, %v782_v52  ;;  %v804_v54 = vrot.slane %v803_v10, 1 }
 0x573   : > { %v807_v55 = vmul.f32 0.015625, %v806_v53  ;;  %v805_v56 = vadd.f32 %v804_v54, %v803_v10 }
 0x575   : > { %v808_v57 = vsub.f32 %v805_v56, %v807_v55 }
 0x577   : > { %v809_v59 = vmul.f32 0.015873017, %v808_v57 }
 0x579   : > { %v810_v60 = vmax.f32 %v809_v59, 0.0 }
 0x57b   : > { %1015 = vrsqrt.f32 %v810_v60  ;;  %vm813_vm4 = vcmp.eq.f32.partialorder %v810_v60, inf  ;;  %v816_v14 = vand.u32 2147483648, %v810_v60  ;;  %vm815_vm5 = vcmp.eq.f32.partialorder %v810_v60, 0.0 }
 0x588   : > { %v1016_v61 = vpop.eup %1015 }
 0x589   : > { %v812_v11 = vmul.f32 %v1016_v61, %v810_v60 }
 0x58b   : > { %v814_v63 = vsel %vm813_vm4, %v810_v60, %v812_v11 }
 0x58c   : > { %v817_v0 = vsel %vm815_vm5, %v816_v14, %v814_v63 }
 0x58d   : > { %818 = vst [vmem:[%s201_s22] sm:$0xff] %v817_v0 }
 0x58e   : > { %1086 = shalt.err (!%p1083_p4)
}
 0x58f   : > { %s1087_s19 = scalar_lea.hbm %s1617_s30, 128  ;;  %s1091_s5 = scalar_lea.hbm %s1656_s2, 256 }
 0x590   : > { %p1088_p9 = scmp.ne.s32.totalorder %s1617_s30, %s1087_s19  ;;  %p1092_p5 = scmp.lt.s32.totalorder %s1617_s30, %s1656_s2 }
 0x591   : > { %p1093_p8 = scmp.lt.s32.totalorder %s1091_s5, %s1087_s19 }
 0x592   : > { %p1089_p11 = pnand %p1088_p9, %p1665_p1 }
 0x593   : > { %p1094_p6 = por %p1093_p8, %p1092_p5 }
 0x594   : > { %p1090_p3 = pneg %p1089_p11 }
 0x596   : > { %p1095_p13 = pnand %p1094_p6, %p1090_p3 }
 0x598   : > { %1098 = shalt.err (!%p1095_p13)
}
 0x599   : > { %946 = dma.vmem_to_hbm [thread:$0]  (%p1665_p1), %s834_s24, 128, %s1617_s30, %s820_s3  }
 0x59a PF: > { %s845_s27 = sand.u32 1, %s1129_s9   ;;  %p1666_p12 = scmp.ne.s32.totalorder %s1661_s21, 0 }
 0x59b   : > { %p1667_p7 = scmp.ge.s32.totalorder %s1141_s12, 2  ;;  %s846_s23 = scalar_lea.sflag [#allocation4], %s845_s27 }
 0x59d   : > { %p956_p10 = pnand %p1667_p7, %p1666_p12 }
 0x59f   : > { %p957_p0 = pneg %p956_p10 }
 0x5a1   : > { %1124 = dma.done.wait (%p957_p0), %s846_s23, 128  }
 0x5a2   : > { %1126 = vsyncadd (%p957_p0), %s846_s23, 4294967168  ;;  %p18_p2 = scmp.ge.s32.totalorder %s1196_s15, 4   ;;  %s1668_s9 = smov %s1133_s10 }
 0x5a3   : > { %s1669_s10 = smov %s1137_s11  ;;  %s1670_s11 = smov %s1208_s18 }
 0x5a4   : > { %s1671_s12 = smov %s1196_s15  ;;  %20 = sbr.rel (!%p18_p2) target bundleno = 7 (0x7), region = 86 }
 0x5a9   :  { %851 = vsyncpa [#allocation3], 1 }
 0x5aa   :  { %853 = vsyncpa [#allocation3 + $0x1], 1 }
 0x5ab   :  { %854 = vsyncpa [#allocation6], 1 }
 0x5ac   :  { %856 = vsyncpa [#allocation6 + $0x1], 1 }
 0x5ad   :  { %857 = vsyncpa [#allocation4], 1 }
 0x5ae   :  { %859 = vsyncpa [#allocation4 + $0x1], 1 }

</bundles_post_ra>
